<compile_context>
chip_gen: v5e
topology: v5e:2x2
jax: 0.10.0
libtpu: 0.0.40
codegen_flags: <defaults>
</compile_context>

<pallas_src>
import functools

import jax
import jax.numpy as jnp
from jax.experimental import pallas as pl
from jax.experimental.pallas import tpu as pltpu


def _round_up(x, m):
    return ((x + m - 1) // m) * m


def _pick_vmem_limit():
    """Scoped-VMEM limit: ~3/4 of physical VMEM, capped at 96 MiB.
    -> ~96 MiB on v5e/v6e (128 MiB physical), ~48 MiB on v7x (64 MiB/TC)."""
    phys = 64 * 1024 * 1024  # conservative default (v7x per-TC) if query fails
    try:
        phys = int(pltpu.get_tpu_info().vmem_capacity_bytes)
    except Exception:
        pass
    return int(min(96 * 1024 * 1024, max(32 * 1024 * 1024, (phys * 3) // 4)))


def _choose_row_tile(n, d, feat_bytes, vmem_limit, feat_bufs):
    """Largest anchor-row strip TQ (multiple of 16, <= 512) whose working set
    fits the scoped-VMEM budget.  Grid uses cdiv(n, TQ); no divisibility needed."""
    n_pad = _round_up(n, 128)                 # lane-padded contrast width
    d_pad = _round_up(d, 128)                 # lane-padded feature width
    resident = feat_bufs * _round_up(n, 16) * d_pad * feat_bytes   # [N, D] features
    resident += 2 * 8 * n_pad * 4                                  # [1, N] labels
    avail = vmem_limit - resident - (4 << 20)                      # misc headroom
    if avail <= 0:
        avail = max(vmem_limit // 8, 1 << 20)
    # Per anchor row: 2x clean-output buffers + ~4 live [., N] f32 temps
    # (logits, exp, positives, rolled/clean) + 2x bf16 anchor-row buffers +
    # lane-padded [TQ, 1] label / loss columns.
    per_row = (2 + 4) * n_pad * 4 + 2 * d_pad * feat_bytes + 4 * 128 * 4
    tq = int(avail // per_row)
    if tq >= n:
        return n
    tq = max(16, (tq // 16) * 16)
    if tq >= 128:
        tq = (tq // 128) * 128      # full MXU M-tiles (128 on v5e, 256 on v6e+)
    tq = min(tq, 512, n)
    if tq >= n:
        return n
    # Prefer an even strip count so dimension_semantics=("parallel",) splits
    # evenly across the two TensorCores on v7x.
    g = pl.cdiv(n, tq)
    if g > 1 and g % 2 == 1:
        tq_alt = _round_up(pl.cdiv(n, g + 1), 16)
        if 16 <= tq_alt <= tq and pl.cdiv(n, tq_alt) % 2 == 0:
            tq = tq_alt
    return tq


def _supcon_strip_kernel(row_lab_ref, col_lab_ref, anchor_ref, feat_ref,
                         clean_ref, loss_ref, *, inv_temp, loss_scale):
    # row_lab_ref: [TQ, 1] int32   labels of the anchor rows in this strip
    # col_lab_ref: [1,  N] int32   labels of all contrast columns (resident)
    # anchor_ref:  [TQ, D] bf16    anchor feature strip for this grid step
    # feat_ref:    [N,  D] bf16    full contrast features (resident)
    # clean_ref:   [TQ, N-1] f32   off-diagonal exp_logits strip (fused output)
    # loss_ref:    [TQ, 1] f32     per-anchor loss
    tq = anchor_ref.shape[0]
    n = feat_ref.shape[0]
    q = pl.program_id(0)

    # anchor_dot_contrast / temperature: contraction on the last dims of both
    # operands (no transpose / XLU copy), bf16 MXU inputs, f32 accumulation.
    s = jax.lax.dot_general(
        anchor_ref[...], feat_ref[...],
        dimension_numbers=(((1,), (1,)), ((), ())),
        preferred_element_type=jnp.float32) * inv_temp          # [TQ, N] f32

    # Global row / column indices.  Row iota kept as [TQ, 1] (fewer live
    # [TQ, N] temporaries, per review).
    row_ids = jax.lax.broadcasted_iota(jnp.int32, (tq, 1), 0) + q * tq
    col_ids = jax.lax.broadcasted_iota(jnp.int32, (tq, n), 1)
    not_self = col_ids != row_ids                               # logits_mask

    # Numerically stable logits; row max over the unmasked row (matches torch).
    row_max = jnp.max(s, axis=1, keepdims=True)
    logits = s - row_max
    exp_all = jnp.exp(logits)                                   # diag NOT zeroed
    denom = jnp.sum(jnp.where(not_self, exp_all, 0.0), axis=1, keepdims=True)
    log_denom = jnp.log(denom)

    # Positives: same label AND not the anchor itself (mask rebuilt in-kernel,
    # never materialized in HBM).
    pos_f = jnp.logical_and(row_lab_ref[...] == col_lab_ref[...],
                            not_self).astype(jnp.float32)
    pos_cnt = jnp.sum(pos_f, axis=1, keepdims=True)
    pos_dot = jnp.sum(pos_f * logits, axis=1, keepdims=True)

    # mean_log_prob_pos = sum(pos * (logits - log_denom)) / count
    #                   = pos_dot / count - log_denom.
    # Exact division (review): count is only a [TQ, 1] vector.  Guard count==0
    # (torch would yield NaN; with n_views >= 2 every anchor has a positive).
    mean_log_prob_pos = pos_dot / jnp.maximum(pos_cnt, 1.0) - log_denom
    loss_ref[...] = (-loss_scale) * mean_log_prob_pos

    # Fused off-diagonal extraction (review item #1):
    #   clean[i, j] = exp[i, j]      for j <  i
    #               = exp[i, j + 1]  for j >= i
    # shifted[:, j] = exp[:, (j + 1) % n]  (pltpu.roll == np.roll semantics,
    # XLU slot).  The diagonal element is never selected, so exp_all does not
    # need its diagonal zeroed for this output.
    shifted = pltpu.roll(exp_all, shift=n - 1, axis=1)
    clean = jnp.where(col_ids < row_ids, exp_all, shifted)
    clean_ref[...] = clean[:, : n - 1].astype(clean_ref.dtype)


class SupConLossDDP:
    """JAX/Pallas re-implementation of the PyTorch SupConLossDDP forward."""

    def __init__(self, temperature=0.5, contrast_mode='ALL_VIEWS',
                 base_temperature=0.07, min_class=None,
                 ratio_remove_majority_class_from_numerator=-1.0,
                 ratio_remove_majority_class_from_denominator=-1.0,
                 weighting_positives=-1.0, reweight_global_min_loss=-1.0,
                 matmul_dtype=jnp.bfloat16, clean_logits_dtype=jnp.float32):
        assert contrast_mode == 'ALL_VIEWS'
        # TODO(synk): ratio_* > 0 paths (torch.randperm-based masks) not implemented.
        assert ratio_remove_majority_class_from_numerator <= 0.0
        assert ratio_remove_majority_class_from_denominator <= 0.0
        self.temperature = float(temperature)
        self.base_temperature = float(base_temperature)
        self.minority_class = int(min_class) if min_class is not None else 1
        self.majority_class = 0 if self.minority_class == 1 else 1
        self.weighting_positives = weighting_positives
        self.reweight_global_min_loss = reweight_global_min_loss
        self.matmul_dtype = matmul_dtype
        self.clean_logits_dtype = clean_logits_dtype

    def _pallas_forward(self, contrast, row_lab, col_lab, tq, vmem_limit,
                        single_buffer_residents):
        n, d = contrast.shape
        loss_scale = (self.temperature / self.base_temperature
                      if self.base_temperature > 0.0 else 1.0)
        kernel = functools.partial(_supcon_strip_kernel,
                                   inv_temp=1.0 / self.temperature,
                                   loss_scale=loss_scale)

        def resident(shape):
            # Constant-index (grid-invariant) inputs: request single buffering
            # to halve their VMEM footprint (review item #2).
            if single_buffer_residents:
                return pl.BlockSpec(shape, lambda q: (0, 0),
                                    pipeline_mode=pl.Buffered(1))
            return pl.BlockSpec(shape, lambda q: (0, 0))

        return pl.pallas_call(
            kernel,
            grid=(pl.cdiv(n, tq),),
            in_specs=[
                pl.BlockSpec((tq, 1), lambda q: (q, 0)),     # anchor-row labels
                resident((1, n)),                            # contrast labels
                pl.BlockSpec((tq, d), lambda q: (q, 0)),     # anchor strip
                resident((n, d)),                            # contrast features
            ],
            out_specs=(
                pl.BlockSpec((tq, n - 1), lambda q: (q, 0)),  # clean_logits strip
                pl.BlockSpec((tq, 1), lambda q: (q, 0)),      # per-anchor loss
            ),
            out_shape=(
                jax.ShapeDtypeStruct((n, n - 1), self.clean_logits_dtype),
                jax.ShapeDtypeStruct((n, 1), jnp.float32),
            ),
            compiler_params=pltpu.CompilerParams(
                dimension_semantics=("parallel",),
                vmem_limit_bytes=int(vmem_limit)),
        )(row_lab, col_lab, contrast, contrast)

    def __call__(self, features, labels=None):
        if features.ndim < 3:
            raise ValueError('`features` needs to be [bsz, n_views, ...], '
                             'at least 3 dimensions are required')
        if features.ndim > 3:
            features = features.reshape(features.shape[0], features.shape[1], -1)

        bsz, n_views, d = features.shape
        n = bsz * n_views

        # contrast_feature = cat(unbind(features, 1), 0) -> view-major rows.
        contrast = jnp.transpose(features, (1, 0, 2)).reshape(n, d)
        contrast = contrast.astype(self.matmul_dtype)

        # Labels per contrast row.  labels=None -> unsupervised eye-mask, which
        # is identical to giving every sample a distinct label.
        if labels is None:
            base_labels = jnp.arange(bsz, dtype=jnp.int32)
        else:
            base_labels = jnp.asarray(labels).reshape(-1).astype(jnp.int32)
            if base_labels.shape[0] != bsz:
                raise ValueError('Number of labels does not match number of features')
        lab = jnp.tile(base_labels, n_views)          # lab[i] = labels[i % bsz]
        row_lab = lab.reshape(n, 1)
        col_lab = lab.reshape(1, n)

        vmem_limit = _pick_vmem_limit()
        feat_bytes = jnp.dtype(self.matmul_dtype).itemsize

        # Try single-buffered residents first; fall back to default
        # double-buffering if this JAX version rejects pipeline_mode/Buffered(1).
        try:
            tq = _choose_row_tile(n, d, feat_bytes, vmem_limit, feat_bufs=1)
            clean_logits, loss_rows = self._pallas_forward(
                contrast, row_lab, col_lab, tq, vmem_limit, True)
        except Exception:
            tq = _choose_row_tile(n, d, feat_bytes, vmem_limit, feat_bufs=2)
            clean_logits, loss_rows = self._pallas_forward(
                contrast, row_lab, col_lab, tq, vmem_limit, False)

        # mean over all anchors == loss.view(anchor_count, batch_size).mean()
        loss = jnp.mean(loss_rows)

        # Output labels (same construction as the torch code — it implicitly
        # assumes n_views == 2).
        out_labels = jnp.concatenate(
            [jnp.arange(bsz, dtype=jnp.int32) + bsz - 1,
             jnp.arange(bsz, dtype=jnp.int32)], axis=0)

        return loss, clean_logits, out_labels


def _reference_jnp(features, labels, temperature, base_temperature):
    """Pure-jnp reference of the same forward (bf16 matmul to match the kernel)."""
    bsz, n_views, d = features.shape
    n = bsz * n_views
    a = jnp.transpose(features, (1, 0, 2)).reshape(n, d).astype(jnp.bfloat16)
    s = jax.lax.dot_general(a, a, (((1,), (1,)), ((), ())),
                            preferred_element_type=jnp.float32) / temperature
    logits = s - jnp.max(s, axis=1, keepdims=True)
    logits_mask = 1.0 - jnp.eye(n, dtype=jnp.float32)
    mask = jnp.tile((labels[:, None] == labels[None, :]).astype(jnp.float32),
                    (n_views, n_views)) * logits_mask
    exp_l = jnp.exp(logits) * logits_mask
    log_prob = logits - jnp.log(jnp.sum(exp_l, axis=1, keepdims=True))
    mlpp = jnp.sum(mask * log_prob, axis=1) / jnp.sum(mask, axis=1)
    loss = jnp.mean(-(temperature / base_temperature) * mlpp)
    clean = exp_l.reshape(-1)[1:].reshape(n - 1, n + 1)[:, :-1].reshape(n, n - 1)
    return loss, clean


if __name__ == "__main__":
    key = jax.random.PRNGKey(0)
    k1, k2 = jax.random.split(key)

    bsz, n_views, c, h = 8, 2, 4, 8          # features flattened to D = 32, N = 16
    features = jax.random.normal(k1, (bsz, n_views, c, h), dtype=jnp.float32)
    # L2-normalize the flattened embeddings (typical SupCon input).
    flat = features.reshape(bsz, n_views, -1)
    flat = flat / jnp.linalg.norm(flat, axis=-1, keepdims=True)
    features = flat.reshape(bsz, n_views, c, h)

    labels = jax.random.bernoulli(k2, 0.375, (bsz,)).astype(jnp.int32)

    loss_mod = SupConLossDDP(temperature=0.5, base_temperature=0.07, min_class=1)
    loss, clean_logits, out_labels = loss_mod(features, labels)
    jax.block_until_ready((loss, clean_logits, out_labels))

    # Sanity check vs pure-jnp reference.
    ref_loss, ref_clean = _reference_jnp(flat, labels, 0.5, 0.07)
    assert clean_logits.shape == (bsz * n_views, bsz * n_views - 1)
    assert out_labels.shape == (2 * bsz,)
    assert jnp.allclose(clean_logits, ref_clean, rtol=1e-3, atol=1e-4), \
        (float(jnp.max(jnp.abs(clean_logits - ref_clean))),)
    assert jnp.allclose(loss, ref_loss, rtol=2e-2, atol=1e-3), (loss, ref_loss)

    print("KERNEL_OK")
</pallas_src>

<mosaic_0001>
module attributes {stable_mosaic.version = 11 : i64} {
  func.func @_supcon_strip_kernel(%arg0: i32, %arg1: memref<16x1xi32, #tpu.memory_space<vmem>>, %arg2: memref<1x16xi32, #tpu.memory_space<vmem>>, %arg3: memref<16x32xbf16, #tpu.memory_space<vmem>>, %arg4: memref<16x32xbf16, #tpu.memory_space<vmem>>, %arg5: memref<16x15xf32, #tpu.memory_space<vmem>>, %arg6: memref<16x1xf32, #tpu.memory_space<vmem>>) attributes {dimension_semantics = [#tpu.dimension_semantics<parallel>], iteration_bounds = array<i64: 1>, scalar_prefetch = 0 : i64, scratch_operands = 0 : i64, tpu.core_type = #tpu.core_type<tc>, window_params = [{transform_indices = @transform_0, window_bounds = array<i64: 16, 1>}, {pipeline_mode = #tpu.pipeline_mode<synchronous>, transform_indices = @transform_1, window_bounds = array<i64: 1, 16>}, {transform_indices = @transform_2, window_bounds = array<i64: 16, 32>}, {pipeline_mode = #tpu.pipeline_mode<synchronous>, transform_indices = @transform_3, window_bounds = array<i64: 16, 32>}, {transform_indices = @transform_4, window_bounds = array<i64: 16, 15>}, {transform_indices = @transform_5, window_bounds = array<i64: 16, 1>}]} {
    %c0 = arith.constant 0 : index
    %c0_0 = arith.constant 0 : index
    %0 = vector.load %arg3[%c0, %c0_0] : memref<16x32xbf16, #tpu.memory_space<vmem>>, vector<16x32xbf16>
    %c0_1 = arith.constant 0 : index
    %c0_2 = arith.constant 0 : index
    %1 = vector.load %arg4[%c0_1, %c0_2] : memref<16x32xbf16, #tpu.memory_space<vmem>>, vector<16x32xbf16>
    %cst = arith.constant dense<0.000000e+00> : vector<16x16xf32>
    %2 = tpu.matmul %0, %1, %cst {dimension_numbers = #tpu.dot_dimension_numbers<[1], [1], [0], [0], [0, 0, 1, 0], [], []>} : vector<16x32xbf16>, vector<16x32xbf16>, vector<16x16xf32> -> vector<16x16xf32>
    %cst_3 = arith.constant 2.000000e+00 : f32
    %3 = vector.broadcast %cst_3 : f32 to vector<16x16xf32>
    %4 = arith.mulf %2, %3 : vector<16x16xf32>
    %5 = tpu.iota {dimensions = array<i32: 0>} : vector<16x1xi32>
    %c16_i32 = arith.constant 16 : i32
    %6 = arith.muli %arg0, %c16_i32 : i32
    %7 = vector.broadcast %6 : i32 to vector<16x1xi32>
    %8 = arith.addi %5, %7 : vector<16x1xi32>
    %9 = tpu.iota {dimensions = array<i32: 1>} : vector<16x16xi32>
    %10 = vector.broadcast %8 : vector<16x1xi32> to vector<16x16xi32>
    %11 = arith.cmpi ne, %9, %10 : vector<16x16xi32>
    %cst_4 = arith.constant dense<0xFF800000> : vector<16xf32>
    %12 = vector.multi_reduction <maximumf>, %4, %cst_4 [1] : vector<16x16xf32> to vector<16xf32>
    %13 = vector.shape_cast %12 : vector<16xf32> to vector<16x1xf32>
    %14 = vector.broadcast %13 : vector<16x1xf32> to vector<16x16xf32>
    %15 = arith.subf %4, %14 : vector<16x16xf32>
    %16 = math.exp %15 : vector<16x16xf32>
    %cst_5 = arith.constant 0.000000e+00 : f32
    %17 = vector.broadcast %cst_5 : f32 to vector<16x16xf32>
    %18 = arith.select %11, %16, %17 : vector<16x16xi1>, vector<16x16xf32>
    %cst_6 = arith.constant dense<0.000000e+00> : vector<16xf32>
    %19 = vector.multi_reduction <add>, %18, %cst_6 [1] : vector<16x16xf32> to vector<16xf32>
    %20 = vector.shape_cast %19 : vector<16xf32> to vector<16x1xf32>
    %21 = math.log %20 : vector<16x1xf32>
    %c0_7 = arith.constant 0 : index
    %c0_8 = arith.constant 0 : index
    %22 = vector.load %arg1[%c0_7, %c0_8] : memref<16x1xi32, #tpu.memory_space<vmem>>, vector<16x1xi32>
    %c0_9 = arith.constant 0 : index
    %c0_10 = arith.constant 0 : index
    %23 = vector.load %arg2[%c0_9, %c0_10] : memref<1x16xi32, #tpu.memory_space<vmem>>, vector<1x16xi32>
    %24 = vector.broadcast %22 : vector<16x1xi32> to vector<16x16xi32>
    %25 = vector.broadcast %23 : vector<1x16xi32> to vector<16x16xi32>
    %26 = arith.cmpi eq, %24, %25 : vector<16x16xi32>
    %27 = arith.andi %26, %11 : vector<16x16xi1>
    %28 = arith.extui %27 : vector<16x16xi1> to vector<16x16xi32>
    %29 = arith.sitofp %28 : vector<16x16xi32> to vector<16x16xf32>
    %cst_11 = arith.constant dense<0.000000e+00> : vector<16xf32>
    %30 = vector.multi_reduction <add>, %29, %cst_11 [1] : vector<16x16xf32> to vector<16xf32>
    %31 = vector.shape_cast %30 : vector<16xf32> to vector<16x1xf32>
    %32 = arith.mulf %29, %15 : vector<16x16xf32>
    %cst_12 = arith.constant dense<0.000000e+00> : vector<16xf32>
    %33 = vector.multi_reduction <add>, %32, %cst_12 [1] : vector<16x16xf32> to vector<16xf32>
    %34 = vector.shape_cast %33 : vector<16xf32> to vector<16x1xf32>
    %cst_13 = arith.constant 1.000000e+00 : f32
    %35 = vector.broadcast %cst_13 : f32 to vector<16x1xf32>
    %36 = arith.maximumf %31, %35 : vector<16x1xf32>
    %37 = arith.divf %34, %36 : vector<16x1xf32>
    %38 = arith.subf %37, %21 : vector<16x1xf32>
    %cst_14 = arith.constant -7.14285707 : f32
    %39 = vector.broadcast %cst_14 : f32 to vector<16x1xf32>
    %40 = arith.mulf %39, %38 : vector<16x1xf32>
    %c0_15 = arith.constant 0 : index
    %c0_16 = arith.constant 0 : index
    %41 = vector.load %arg6[%c0_15, %c0_16] : memref<16x1xf32, #tpu.memory_space<vmem>>, vector<16x1xf32>
    tpu.vector_store %arg6[%c0_15, %c0_16], %40 {strides = array<i32>} : memref<16x1xf32, #tpu.memory_space<vmem>>, vector<16x1xf32>,
    %c15_i32 = arith.constant 15 : i32
    %42 = tpu.dynamic_rotate %16 by %c15_i32 dim 1 : vector<16x16xf32>, i32 -> vector<16x16xf32>
    %43 = vector.broadcast %8 : vector<16x1xi32> to vector<16x16xi32>
    %44 = arith.cmpi slt, %9, %43 : vector<16x16xi32>
    %45 = arith.select %44, %16, %42 : vector<16x16xi1>, vector<16x16xf32>
    %46 = vector.extract_strided_slice %45 {offsets = [0, 0], sizes = [16, 15], strides = [1, 1]} : vector<16x16xf32> to vector<16x15xf32>
    %c0_17 = arith.constant 0 : index
    %c0_18 = arith.constant 0 : index
    %47 = vector.load %arg5[%c0_17, %c0_18] : memref<16x15xf32, #tpu.memory_space<vmem>>, vector<16x15xf32>
    tpu.vector_store %arg5[%c0_17, %c0_18], %46 {strides = array<i32>} : memref<16x15xf32, #tpu.memory_space<vmem>>, vector<16x15xf32>,
    return
  }
  func.func @transform_0(%arg0: i32) -> (i32, i32) {
    %c0_i32 = arith.constant 0 : i32
    %c0_i32_0 = arith.constant 0 : i32
    return %arg0, %c0_i32 : i32, i32
  }
  func.func @transform_1(%arg0: i32) -> (i32, i32) {
    %c0_i32 = arith.constant 0 : i32
    %c0_i32_0 = arith.constant 0 : i32
    %c0_i32_1 = arith.constant 0 : i32
    return %c0_i32, %c0_i32_0 : i32, i32
  }
  func.func @transform_2(%arg0: i32) -> (i32, i32) {
    %c0_i32 = arith.constant 0 : i32
    %c0_i32_0 = arith.constant 0 : i32
    return %arg0, %c0_i32 : i32, i32
  }
  func.func @transform_3(%arg0: i32) -> (i32, i32) {
    %c0_i32 = arith.constant 0 : i32
    %c0_i32_0 = arith.constant 0 : i32
    %c0_i32_1 = arith.constant 0 : i32
    return %c0_i32, %c0_i32_0 : i32, i32
  }
  func.func @transform_4(%arg0: i32) -> (i32, i32) {
    %c0_i32 = arith.constant 0 : i32
    %c0_i32_0 = arith.constant 0 : i32
    return %arg0, %c0_i32 : i32, i32
  }
  func.func @transform_5(%arg0: i32) -> (i32, i32) {
    %c0_i32 = arith.constant 0 : i32
    %c0_i32_0 = arith.constant 0 : i32
    return %arg0, %c0_i32 : i32, i32
  }
}

module attributes {stable_mosaic.version = 11 : i64} {
  func.func @_supcon_strip_kernel(%arg0: i32, %arg1: memref<16x1xi32, #tpu.memory_space<vmem>>, %arg2: memref<1x16xi32, #tpu.memory_space<vmem>>, %arg3: memref<16x32xbf16, #tpu.memory_space<vmem>>, %arg4: memref<16x32xbf16, #tpu.memory_space<vmem>>, %arg5: memref<16x15xf32, #tpu.memory_space<vmem>>, %arg6: memref<16x1xf32, #tpu.memory_space<vmem>>) attributes {dimension_semantics = [#tpu.dimension_semantics<parallel>], iteration_bounds = array<i64: 1>, scalar_prefetch = 0 : i64, scratch_operands = 0 : i64, tpu.core_type = #tpu.core_type<tc>, window_params = [{transform_indices = @transform_0, window_bounds = array<i64: 16, 1>}, {pipeline_mode = #tpu.pipeline_mode<synchronous>, transform_indices = @transform_1, window_bounds = array<i64: 1, 16>}, {transform_indices = @transform_2, window_bounds = array<i64: 16, 32>}, {pipeline_mode = #tpu.pipeline_mode<synchronous>, transform_indices = @transform_3, window_bounds = array<i64: 16, 32>}, {transform_indices = @transform_4, window_bounds = array<i64: 16, 15>}, {transform_indices = @transform_5, window_bounds = array<i64: 16, 1>}]} {
    %c0 = arith.constant 0 : index
    %c0_0 = arith.constant 0 : index
    %0 = vector.load %arg3[%c0, %c0_0] : memref<16x32xbf16, #tpu.memory_space<vmem>>, vector<16x32xbf16>
    %c0_1 = arith.constant 0 : index
    %c0_2 = arith.constant 0 : index
    %1 = vector.load %arg4[%c0_1, %c0_2] : memref<16x32xbf16, #tpu.memory_space<vmem>>, vector<16x32xbf16>
    %cst = arith.constant dense<0.000000e+00> : vector<16x16xf32>
    %2 = tpu.matmul %0, %1, %cst {dimension_numbers = #tpu.dot_dimension_numbers<[1], [1], [0], [0], [0, 0, 1, 0], [], []>} : vector<16x32xbf16>, vector<16x32xbf16>, vector<16x16xf32> -> vector<16x16xf32>
    %cst_3 = arith.constant 2.000000e+00 : f32
    %3 = vector.broadcast %cst_3 : f32 to vector<16x16xf32>
    %4 = arith.mulf %2, %3 : vector<16x16xf32>
    %5 = tpu.iota {dimensions = array<i32: 0>} : vector<16x1xi32>
    %c16_i32 = arith.constant 16 : i32
    %6 = arith.muli %arg0, %c16_i32 : i32
    %7 = vector.broadcast %6 : i32 to vector<16x1xi32>
    %8 = arith.addi %5, %7 : vector<16x1xi32>
    %9 = tpu.iota {dimensions = array<i32: 1>} : vector<16x16xi32>
    %10 = vector.broadcast %8 : vector<16x1xi32> to vector<16x16xi32>
    %11 = arith.cmpi ne, %9, %10 : vector<16x16xi32>
    %cst_4 = arith.constant dense<0xFF800000> : vector<16xf32>
    %12 = vector.multi_reduction <maximumf>, %4, %cst_4 [1] : vector<16x16xf32> to vector<16xf32>
    %13 = vector.shape_cast %12 : vector<16xf32> to vector<16x1xf32>
    %14 = vector.broadcast %13 : vector<16x1xf32> to vector<16x16xf32>
    %15 = arith.subf %4, %14 : vector<16x16xf32>
    %16 = math.exp %15 : vector<16x16xf32>
    %cst_5 = arith.constant 0.000000e+00 : f32
    %17 = vector.broadcast %cst_5 : f32 to vector<16x16xf32>
    %18 = arith.select %11, %16, %17 : vector<16x16xi1>, vector<16x16xf32>
    %cst_6 = arith.constant dense<0.000000e+00> : vector<16xf32>
    %19 = vector.multi_reduction <add>, %18, %cst_6 [1] : vector<16x16xf32> to vector<16xf32>
    %20 = vector.shape_cast %19 : vector<16xf32> to vector<16x1xf32>
    %21 = math.log %20 : vector<16x1xf32>
    %c0_7 = arith.constant 0 : index
    %c0_8 = arith.constant 0 : index
    %22 = vector.load %arg1[%c0_7, %c0_8] : memref<16x1xi32, #tpu.memory_space<vmem>>, vector<16x1xi32>
    %c0_9 = arith.constant 0 : index
    %c0_10 = arith.constant 0 : index
    %23 = vector.load %arg2[%c0_9, %c0_10] : memref<1x16xi32, #tpu.memory_space<vmem>>, vector<1x16xi32>
    %24 = vector.broadcast %22 : vector<16x1xi32> to vector<16x16xi32>
    %25 = vector.broadcast %23 : vector<1x16xi32> to vector<16x16xi32>
    %26 = arith.cmpi eq, %24, %25 : vector<16x16xi32>
    %27 = arith.andi %26, %11 : vector<16x16xi1>
    %28 = arith.extui %27 : vector<16x16xi1> to vector<16x16xi32>
    %29 = arith.sitofp %28 : vector<16x16xi32> to vector<16x16xf32>
    %cst_11 = arith.constant dense<0.000000e+00> : vector<16xf32>
    %30 = vector.multi_reduction <add>, %29, %cst_11 [1] : vector<16x16xf32> to vector<16xf32>
    %31 = vector.shape_cast %30 : vector<16xf32> to vector<16x1xf32>
    %32 = arith.mulf %29, %15 : vector<16x16xf32>
    %cst_12 = arith.constant dense<0.000000e+00> : vector<16xf32>
    %33 = vector.multi_reduction <add>, %32, %cst_12 [1] : vector<16x16xf32> to vector<16xf32>
    %34 = vector.shape_cast %33 : vector<16xf32> to vector<16x1xf32>
    %cst_13 = arith.constant 1.000000e+00 : f32
    %35 = vector.broadcast %cst_13 : f32 to vector<16x1xf32>
    %36 = arith.maximumf %31, %35 : vector<16x1xf32>
    %37 = arith.divf %34, %36 : vector<16x1xf32>
    %38 = arith.subf %37, %21 : vector<16x1xf32>
    %cst_14 = arith.constant -7.14285707 : f32
    %39 = vector.broadcast %cst_14 : f32 to vector<16x1xf32>
    %40 = arith.mulf %39, %38 : vector<16x1xf32>
    %c0_15 = arith.constant 0 : index
    %c0_16 = arith.constant 0 : index
    %41 = vector.load %arg6[%c0_15, %c0_16] : memref<16x1xf32, #tpu.memory_space<vmem>>, vector<16x1xf32>
    tpu.vector_store %arg6[%c0_15, %c0_16], %40 {strides = array<i32>} : memref<16x1xf32, #tpu.memory_space<vmem>>, vector<16x1xf32>,
    %c15_i32 = arith.constant 15 : i32
    %42 = tpu.dynamic_rotate %16 by %c15_i32 dim 1 : vector<16x16xf32>, i32 -> vector<16x16xf32>
    %43 = vector.broadcast %8 : vector<16x1xi32> to vector<16x16xi32>
    %44 = arith.cmpi slt, %9, %43 : vector<16x16xi32>
    %45 = arith.select %44, %16, %42 : vector<16x16xi1>, vector<16x16xf32>
    %46 = vector.extract_strided_slice %45 {offsets = [0, 0], sizes = [16, 15], strides = [1, 1]} : vector<16x16xf32> to vector<16x15xf32>
    %c0_17 = arith.constant 0 : index
    %c0_18 = arith.constant 0 : index
    %47 = vector.load %arg5[%c0_17, %c0_18] : memref<16x15xf32, #tpu.memory_space<vmem>>, vector<16x15xf32>
    tpu.vector_store %arg5[%c0_17, %c0_18], %46 {strides = array<i32>} : memref<16x15xf32, #tpu.memory_space<vmem>>, vector<16x15xf32>,
    return
  }
  func.func @transform_0(%arg0: i32) -> (i32, i32) {
    %c0_i32 = arith.constant 0 : i32
    %c0_i32_0 = arith.constant 0 : i32
    return %arg0, %c0_i32 : i32, i32
  }
  func.func @transform_1(%arg0: i32) -> (i32, i32) {
    %c0_i32 = arith.constant 0 : i32
    %c0_i32_0 = arith.constant 0 : i32
    %c0_i32_1 = arith.constant 0 : i32
    return %c0_i32, %c0_i32_0 : i32, i32
  }
  func.func @transform_2(%arg0: i32) -> (i32, i32) {
    %c0_i32 = arith.constant 0 : i32
    %c0_i32_0 = arith.constant 0 : i32
    return %arg0, %c0_i32 : i32, i32
  }
  func.func @transform_3(%arg0: i32) -> (i32, i32) {
    %c0_i32 = arith.constant 0 : i32
    %c0_i32_0 = arith.constant 0 : i32
    %c0_i32_1 = arith.constant 0 : i32
    return %c0_i32, %c0_i32_0 : i32, i32
  }
  func.func @transform_4(%arg0: i32) -> (i32, i32) {
    %c0_i32 = arith.constant 0 : i32
    %c0_i32_0 = arith.constant 0 : i32
    return %arg0, %c0_i32 : i32, i32
  }
  func.func @transform_5(%arg0: i32) -> (i32, i32) {
    %c0_i32 = arith.constant 0 : i32
    %c0_i32_0 = arith.constant 0 : i32
    return %arg0, %c0_i32 : i32, i32
  }
}

</mosaic_0001>

<bundles_post_ra>
// kernel: tpu_custom_call.1
= control target key start
LH: loop header
LB: loop body
LE: loop exit
PB: predicated region body
PF: predicated region fallthrough
CT: control target
= control target key end

     0   :  { %vm35_vm0 = vcmask 261120   ;;  %s390_s0 = inlined_call_operand.vmem [shape: s32[16,1], index: 0, kind: input, shape index: {}]   ;;  %s391_s1 = inlined_call_operand.vmem [shape: s32[1,16], index: 1, kind: input, shape index: {}]   ;;  %s392_s2 = inlined_call_operand.vmem [shape: bf16[16,32], index: 2, kind: input, shape index: {}]   ;;  %s393_s3 = inlined_call_operand.vmem [shape: bf16[16,32], index: 3, kind: input, shape index: {}]   ;;  %s394_s4 = inlined_call_operand.hbm [shape: f32[16,15], index: 4, kind: output, shape index: {0}]   ;;  %s395_s5 = inlined_call_operand.vmem [shape: f32[16,1], index: 5, kind: output, shape index: {1}]  }
   0x1   :  { %v227_v0 = vld [vmem:[%s393_s3] sm:$0xff] }
   0x2   :  { %11 = vsyncpa [#allocation3], 0  ;;  %v40_v1 = vsel %vm35_vm0, %v227_v0, 0  ;;  %v226_v2 = vld [vmem:[%s392_s2] sm:$0xff]  ;;  %v276_v4 = vmov 0   ;;  %v95_v5 = vld [vmem:[%s390_s0 + $0x8] sm:$0xff]  ;;  %v58_v13 = vlaneseq }
   0x3   :  { %49 = vmatpush.bf16.xpose.msra.mxu0 %v40_v1  ;;  %v94_v3 = vld [vmem:[%s390_s0] sm:$0xff]  ;;  %235 = vset.pattern.permute.xlu2 %v276_v4  ;;  %vm69_vm1 = vcmask 130048   ;;  %v277_v19 = vmov 0.0   ;;  %s278_s0 = smov 16   ;;  %vm165_vm8 = vcmask 1047680   ;;  %s280_s30 = smov [#allocation2]  }
   0x4   :  { %236 = vset.pattern.permute.xlu0 %v276_v4  ;;  %98 = vperm.xlu2 %235, %v94_v3   ;;  %v237_v14 = vld [vmem:[%s391_s1] ss:$0 sm:$0xff]  ;;  %v330_v15 = vshrl.u32 %v58_v13, 7  ;;  %v332_v16 = vand.u32 127, %v58_v13  ;;  %s279_s1 = smov 127   ;;  %s197_s6 = sshll.u32 %s280_s30, 4  ;;  %s198_s6 = int_to_ptr.vmem [resolvable:$true] %s197_s6 }
   0x5   :  { %s199_s9 = sshll.u32 %s394_s4, 4  ;;  %s282_s10 = smov 8   ;;  %s200_s9 = int_to_ptr.hbm [resolvable:$true] %s199_s9 }
   0x6   :  { %vm67_vm2 = vcmp.ne.s32.totalorder %v332_v16, %v330_v15  ;;  %v337_v18 = vadd.s32 8, %v330_v15 }
   0x8   :  { %vm68_vm6 = vcmp.ne.s32.totalorder %v332_v16, %v337_v18 }
   0xa   :  { %223 = vmatmul.msk.bf16.vlgmr.msra.gmra.mxu0 %vm35_vm0, %v226_v2 }
   0xc   :  { %101 = vperm.xlu2 %235, %v95_v5  }
  0x5e   :  { %v99_v12 = vpop.permute.xlu2 %98 }
  0x5f   :  { %vm104_vm3 = vcmp.eq.s32.totalorder %v99_v12, %v237_v14 }
  0x60   :  { %vm106_vm4 = vmand %vm104_vm3, %vm67_vm2  ;;  %vm190_vm3 = vcmask 121856  }
  0x61   :  { %v224_v20 = vsel %vm106_vm4, 1.0, %v277_v19  ;;  %vm179_vm4 = vcmp.lt.s32.totalorder %v332_v16, %v337_v18 }
  0x62   :  { %v112_v21 = vsel %vm69_vm1, %v224_v20, 0.0 }
  0x63   :  { %113 = vadd.xlane.f32.xlu2 %v112_v21 }
  0x66   :  { %v102_v17 = vpop.permute.xlu2 %101 }
  0x67   :  { %vm105_vm5 = vcmp.eq.s32.totalorder %v102_v17, %v237_v14 }
  0x68   :  { %vm107_vm7 = vmand %vm105_vm5, %vm68_vm6 }
  0x69   :  { %v225_v22 = vsel %vm107_vm7, 1.0, %v277_v19 }
  0x6a   :  { %v115_v36 = vsel %vm69_vm1, %v225_v22, 0.0 }
  0x87   :  { %v51_v6 = vpop.f32.mrf.mxu0 }
  0x88   :  { %v56_v7 = vmul.f32 2.0, %v51_v6 }
  0x8a   :  { %v70_v8 = vsel %vm69_vm1, %v56_v7, -inf }
  0x8b   :  { %71 = vmax.xlane.f32.xlu0 %v70_v8 }
  0x8f   :  { %v53_v9 = vpop.f32.mrf.mxu0 }
  0x90   :  { %v57_v10 = vmul.f32 2.0, %v53_v9 }
  0x92   :  { %v73_v11 = vsel %vm69_vm1, %v57_v10, -inf }
  0x93   :  { %74 = vmax.xlane.f32.xlu0 %v73_v11 }
  0xd6   :  { %v114_v49 = vpop.xlane.xlu2 %113 }
  0xd7   :  { %v126_v50 = vmax.f32 %v114_v49, 1.0 }
  0xd9   :  { %vm133_vm9 = vweird.f32 %v126_v50  ;;  %v139_v60 = vand.u32 2147483648, %v126_v50  ;;  %v137_v63 = vand.u32 2147483647, %v126_v50 }
  0xdb   :  { %v140_v2 = vor.u32 1.1754944e-38, %v139_v60  ;;  %vm138_vm14 = vcmp.eq.f32.partialorder %v137_v63, 8.507059e+37 }
  0xfe   :  { %v72_v23 = vpop.xlane.xlu0 %71 }
  0xff   :  { %v76_v24 = vsub.f32 %v56_v7, %v72_v23 }
 0x101   :  { %v78_v25 = vmul.f32 1.442695, %v76_v24  ;;  %v118_v34 = vmul.f32 %v224_v20, %v76_v24 }
 0x103   :  { %238 = vpow2.f32 %v78_v25  ;;  %v120_v35 = vsel %vm69_vm1, %v118_v34, 0.0 }
 0x106   :  { %v75_v26 = vpop.xlane.xlu0 %74 }
 0x107   :  { %v77_v27 = vsub.f32 %v57_v10, %v75_v26 }
 0x109   :  { %v348_v28 = vpop.eup %238  ;;  %v80_v29 = vmul.f32 1.442695, %v77_v27  ;;  %v119_v30 = vmul.f32 %v225_v22, %v77_v27 }
 0x10a   :  { %166 = vrot.lane.b32.xlu1 %v348_v28, %s278_s0  ;;  %v82_v41 = vsel %vm67_vm2, %v348_v28, 0.0  ;;  %vm178_vm2 = vcmp.lt.s32.totalorder %v332_v16, %v330_v15 }
 0x10b   :  { %240 = vpow2.f32 %v80_v29  ;;  %v84_v42 = vsel %vm69_vm1, %v82_v41, 0.0  ;;  %v123_v43 = vsel %vm69_vm1, %v119_v30, 0.0 }
 0x10c   :  { %242 = vrcp.f32 %v126_v50 }
 0x111   :  { %v351_v31 = vpop.eup %240 }
 0x112   :  { %169 = vrot.lane.b32.xlu1 %v351_v31, %s278_s0  ;;  %v83_v32 = vsel %vm68_vm6, %v351_v31, 0.0  ;;  %v243_v52 = vpop.eup %242 }
 0x113   :  { %v87_v33 = vsel %vm69_vm1, %v83_v32, 0.0  ;;  %v129_v54 = vmul.f32 %v243_v52, %v126_v50  ;;  %vm134_vm10 = vweird.f32 %v243_v52  ;;  %vm162_vm1 = vcmask 7168  }
 0x114   :  { %88 = vadd.xlane.f32.xlu2 %v87_v33  ;;  %vm135_vm11 = vmor %vm133_vm9, %vm134_vm10 }
 0x115   :  { %v130_v56 = vsub.f32 1.0, %v129_v54 }
 0x117   :  { %v131_v58 = vmul.f32 %v243_v52, %v130_v56 }
 0x119   :  { %v132_v62 = vadd.f32 %v243_v52, %v131_v58 }
 0x11b   :  { %v136_v5 = vsel %vm135_vm11, %v243_v52, %v132_v62 }
 0x11c   :  { %121 = vadd.xlane.f32.xlu2 %v120_v35  ;;  %v141_v7 = vsel %vm138_vm14, %v140_v2, %v136_v5 }
 0x13c   :  { %116 = vadd.xlane.f32.xlu1 %v115_v36 }
 0x17c   :  { %v167_v37 = vpop.permute.xlu1 %166 }
 0x17d   :  { %v168_v38 = vsel %vm165_vm8, %v167_v37, %v348_v28 }
 0x17e   :  { %172 = vrot.lane.b32.xlu0 %v168_v38, %s278_s0 }
 0x184   :  { %v170_v39 = vpop.permute.xlu1 %169 }
 0x185   :  { %v171_v40 = vsel %vm165_vm8, %v170_v39, %v351_v31 }
 0x186   :  { %174 = vrot.lane.b32.xlu1 %v171_v40, %s278_s0 }
 0x187   :  { %v89_v59 = vpop.xlane.xlu2 %88 }
 0x18f   :  { %v122_v8 = vpop.xlane.xlu2 %121 }
 0x190   :  { %v142_v12 = vmul.f32 %v141_v7, %v122_v8 }
 0x1a8   :  { %85 = vadd.xlane.f32.xlu0 %v84_v42 }
 0x1af   :  { %v117_v44 = vpop.xlane.xlu1 %116 }
 0x1b0   :  { %124 = vadd.xlane.f32.xlu1 %v123_v43  ;;  %v127_v51 = vmax.f32 %v117_v44, 1.0 }
 0x1b2   :  { %244 = vrcp.f32 %v127_v51  ;;  %vm148_vm12 = vweird.f32 %v127_v51  ;;  %v154_v1 = vand.u32 2147483648, %v127_v51  ;;  %v152_v4 = vand.u32 2147483647, %v127_v51 }
 0x1b3   :  { %246 = vlog2.f32 %v89_v59 }
 0x1b4   :  { %v155_v6 = vor.u32 1.1754944e-38, %v154_v1  ;;  %vm153_vm0 = vcmp.eq.f32.partialorder %v152_v4, 8.507059e+37 }
 0x1b8   :  { %v245_v53 = vpop.eup %244 }
 0x1b9   :  { %v144_v55 = vmul.f32 %v245_v53, %v127_v51  ;;  %vm149_vm13 = vweird.f32 %v245_v53  ;;  %v247_v10 = vpop.eup %246 }
 0x1ba   :  { %vm150_vm15 = vmor %vm148_vm12, %vm149_vm13  ;;  %v93_v19 = vmul.f32 0.6931472, %v247_v10 }
 0x1bb   :  { %v145_v57 = vsub.f32 1.0, %v144_v55 }
 0x1bd   :  { %v146_v61 = vmul.f32 %v245_v53, %v145_v57 }
 0x1bf   :  { %v147_v3 = vadd.f32 %v245_v53, %v146_v61 }
 0x1c1   :  { %v151_v9 = vsel %vm150_vm15, %v245_v53, %v147_v3 }
 0x1c2   :  { %v156_v14 = vsel %vm153_vm0, %v155_v6, %v151_v9 }
 0x1f0   :  { %v173_v45 = vpop.permute.xlu0 %172 }
 0x1f1   :  { %v176_v46 = vsel %vm165_vm8, %v173_v45, %v348_v28 }
 0x1f2   :  { %182 = vrot.lane.b32.xlu2 %v176_v46, %s279_s1 }
 0x1f8   :  { %v175_v47 = vpop.permute.xlu1 %174 }
 0x1f9   :  { %v177_v48 = vsel %vm165_vm8, %v175_v47, %v351_v31 }
 0x1fa   :  { %184 = vrot.lane.b32.xlu1 %v177_v48, %s279_s1 }
 0x21b   :  { %v86_v0 = vpop.xlane.xlu0 %85 }
 0x21c   :  { %248 = vlog2.f32 %v86_v0 }
 0x222   :  { %v249_v11 = vpop.eup %248 }
 0x223   :  { %v91_v13 = vmul.f32 0.6931472, %v249_v11  ;;  %v125_v17 = vpop.xlane.xlu1 %124 }
 0x224   :  { %v157_v20 = vmul.f32 %v156_v14, %v125_v17 }
 0x225   :  { %v158_v21 = vsub.f32 %v142_v12, %v91_v13 }
 0x226   :  { %v159_v22 = vsub.f32 %v157_v20, %v93_v19 }
 0x227   :  { %v160_v23 = vmul.f32 -7.142857, %v158_v21 }
 0x228   :  { %v161_v24 = vmul.f32 -7.142857, %v159_v22 }
 0x229   :  { %163 = vst.msk [vmem:[%s395_s5] sm:$0xff] %vm162_vm1, %v160_v23 }
 0x22a   :  { %164 = vst.msk [vmem:[%s395_s5 + $0x8] sm:$0xff] %vm162_vm1, %v161_v24  ;;  %s281_s5 = smov 128  }
 0x24c   :  { %v183_v25 = vpop.permute.xlu2 %182 }
 0x24d   :  { %v188_v26 = vsel %vm178_vm2, %v348_v28, %v183_v25 }
 0x24e   :  { %191 = vst.msk [vmem:[#allocation2] sm:$0xff] %vm190_vm3, %v188_v26 }
 0x26c   :  { %v185_v27 = vpop.permute.xlu1 %184 }
 0x26d   :  { %v189_v29 = vsel %vm179_vm4, %v351_v31, %v185_v27 }
 0x26e   :  { %192 = vst.msk [vmem:[#allocation2 + $0x8] sm:$0xff] %vm190_vm3, %v189_v29 }
 0x26f   :  { %205 = dma.vmem_to_hbm [thread:$0]  %s198_s6, 256, %s200_s9, [#allocation3], %s281_s5, %s281_s5, %s282_s10  }
 0x270   :  { %274 = dma.done.wait [#allocation3], 256  }
 0x271   :  { %275 = vsyncadd [#allocation3], 4294967040 }
 0x272   :  { %214 = vsyncpa [#allocation3], 1 }

// kernel: tpu_custom_call.1
= control target key start
LH: loop header
LB: loop body
LE: loop exit
PB: predicated region body
PF: predicated region fallthrough
CT: control target
= control target key end

     0   :  { %vm35_vm0 = vcmask 261120   ;;  %s390_s0 = inlined_call_operand.vmem [shape: s32[16,1], index: 0, kind: input, shape index: {}]   ;;  %s391_s1 = inlined_call_operand.vmem [shape: s32[1,16], index: 1, kind: input, shape index: {}]   ;;  %s392_s2 = inlined_call_operand.vmem [shape: bf16[16,32], index: 2, kind: input, shape index: {}]   ;;  %s393_s3 = inlined_call_operand.vmem [shape: bf16[16,32], index: 3, kind: input, shape index: {}]   ;;  %s394_s4 = inlined_call_operand.hbm [shape: f32[16,15], index: 4, kind: output, shape index: {0}]   ;;  %s395_s5 = inlined_call_operand.vmem [shape: f32[16,1], index: 5, kind: output, shape index: {1}]  }
   0x1   :  { %v227_v0 = vld [vmem:[%s393_s3] sm:$0xff] }
   0x2   :  { %11 = vsyncpa [#allocation3], 0  ;;  %v40_v1 = vsel %vm35_vm0, %v227_v0, 0  ;;  %v226_v2 = vld [vmem:[%s392_s2] sm:$0xff]  ;;  %v276_v4 = vmov 0   ;;  %v95_v5 = vld [vmem:[%s390_s0 + $0x8] sm:$0xff]  ;;  %v58_v13 = vlaneseq }
   0x3   :  { %49 = vmatpush.bf16.xpose.msra.mxu0 %v40_v1  ;;  %v94_v3 = vld [vmem:[%s390_s0] sm:$0xff]  ;;  %235 = vset.pattern.permute.xlu2 %v276_v4  ;;  %vm69_vm1 = vcmask 130048   ;;  %v277_v19 = vmov 0.0   ;;  %s278_s0 = smov 16   ;;  %vm165_vm8 = vcmask 1047680   ;;  %s280_s30 = smov [#allocation2]  }
   0x4   :  { %236 = vset.pattern.permute.xlu0 %v276_v4  ;;  %98 = vperm.xlu2 %235, %v94_v3   ;;  %v237_v14 = vld [vmem:[%s391_s1] ss:$0 sm:$0xff]  ;;  %v330_v15 = vshrl.u32 %v58_v13, 7  ;;  %v332_v16 = vand.u32 127, %v58_v13  ;;  %s279_s1 = smov 127   ;;  %s197_s6 = sshll.u32 %s280_s30, 4  ;;  %s198_s6 = int_to_ptr.vmem [resolvable:$true] %s197_s6 }
   0x5   :  { %s199_s9 = sshll.u32 %s394_s4, 4  ;;  %s282_s10 = smov 8   ;;  %s200_s9 = int_to_ptr.hbm [resolvable:$true] %s199_s9 }
   0x6   :  { %vm67_vm2 = vcmp.ne.s32.totalorder %v332_v16, %v330_v15  ;;  %v337_v18 = vadd.s32 8, %v330_v15 }
   0x8   :  { %vm68_vm6 = vcmp.ne.s32.totalorder %v332_v16, %v337_v18 }
   0xa   :  { %223 = vmatmul.msk.bf16.vlgmr.msra.gmra.mxu0 %vm35_vm0, %v226_v2 }
   0xc   :  { %101 = vperm.xlu2 %235, %v95_v5  }
  0x5e   :  { %v99_v12 = vpop.permute.xlu2 %98 }
  0x5f   :  { %vm104_vm3 = vcmp.eq.s32.totalorder %v99_v12, %v237_v14 }
  0x60   :  { %vm106_vm4 = vmand %vm104_vm3, %vm67_vm2  ;;  %vm190_vm3 = vcmask 121856  }
  0x61   :  { %v224_v20 = vsel %vm106_vm4, 1.0, %v277_v19  ;;  %vm179_vm4 = vcmp.lt.s32.totalorder %v332_v16, %v337_v18 }
  0x62   :  { %v112_v21 = vsel %vm69_vm1, %v224_v20, 0.0 }
  0x63   :  { %113 = vadd.xlane.f32.xlu2 %v112_v21 }
  0x66   :  { %v102_v17 = vpop.permute.xlu2 %101 }
  0x67   :  { %vm105_vm5 = vcmp.eq.s32.totalorder %v102_v17, %v237_v14 }
  0x68   :  { %vm107_vm7 = vmand %vm105_vm5, %vm68_vm6 }
  0x69   :  { %v225_v22 = vsel %vm107_vm7, 1.0, %v277_v19 }
  0x6a   :  { %v115_v36 = vsel %vm69_vm1, %v225_v22, 0.0 }
  0x87   :  { %v51_v6 = vpop.f32.mrf.mxu0 }
  0x88   :  { %v56_v7 = vmul.f32 2.0, %v51_v6 }
  0x8a   :  { %v70_v8 = vsel %vm69_vm1, %v56_v7, -inf }
  0x8b   :  { %71 = vmax.xlane.f32.xlu0 %v70_v8 }
  0x8f   :  { %v53_v9 = vpop.f32.mrf.mxu0 }
  0x90   :  { %v57_v10 = vmul.f32 2.0, %v53_v9 }
  0x92   :  { %v73_v11 = vsel %vm69_vm1, %v57_v10, -inf }
  0x93   :  { %74 = vmax.xlane.f32.xlu0 %v73_v11 }
  0xd6   :  { %v114_v49 = vpop.xlane.xlu2 %113 }
  0xd7   :  { %v126_v50 = vmax.f32 %v114_v49, 1.0 }
  0xd9   :  { %vm133_vm9 = vweird.f32 %v126_v50  ;;  %v139_v60 = vand.u32 2147483648, %v126_v50  ;;  %v137_v63 = vand.u32 2147483647, %v126_v50 }
  0xdb   :  { %v140_v2 = vor.u32 1.1754944e-38, %v139_v60  ;;  %vm138_vm14 = vcmp.eq.f32.partialorder %v137_v63, 8.507059e+37 }
  0xfe   :  { %v72_v23 = vpop.xlane.xlu0 %71 }
  0xff   :  { %v76_v24 = vsub.f32 %v56_v7, %v72_v23 }
 0x101   :  { %v78_v25 = vmul.f32 1.442695, %v76_v24  ;;  %v118_v34 = vmul.f32 %v224_v20, %v76_v24 }
 0x103   :  { %238 = vpow2.f32 %v78_v25  ;;  %v120_v35 = vsel %vm69_vm1, %v118_v34, 0.0 }
 0x106   :  { %v75_v26 = vpop.xlane.xlu0 %74 }
 0x107   :  { %v77_v27 = vsub.f32 %v57_v10, %v75_v26 }
 0x109   :  { %v348_v28 = vpop.eup %238  ;;  %v80_v29 = vmul.f32 1.442695, %v77_v27  ;;  %v119_v30 = vmul.f32 %v225_v22, %v77_v27 }
 0x10a   :  { %166 = vrot.lane.b32.xlu1 %v348_v28, %s278_s0  ;;  %v82_v41 = vsel %vm67_vm2, %v348_v28, 0.0  ;;  %vm178_vm2 = vcmp.lt.s32.totalorder %v332_v16, %v330_v15 }
 0x10b   :  { %240 = vpow2.f32 %v80_v29  ;;  %v84_v42 = vsel %vm69_vm1, %v82_v41, 0.0  ;;  %v123_v43 = vsel %vm69_vm1, %v119_v30, 0.0 }
 0x10c   :  { %242 = vrcp.f32 %v126_v50 }
 0x111   :  { %v351_v31 = vpop.eup %240 }
 0x112   :  { %169 = vrot.lane.b32.xlu1 %v351_v31, %s278_s0  ;;  %v83_v32 = vsel %vm68_vm6, %v351_v31, 0.0  ;;  %v243_v52 = vpop.eup %242 }
 0x113   :  { %v87_v33 = vsel %vm69_vm1, %v83_v32, 0.0  ;;  %v129_v54 = vmul.f32 %v243_v52, %v126_v50  ;;  %vm134_vm10 = vweird.f32 %v243_v52  ;;  %vm162_vm1 = vcmask 7168  }
 0x114   :  { %88 = vadd.xlane.f32.xlu2 %v87_v33  ;;  %vm135_vm11 = vmor %vm133_vm9, %vm134_vm10 }
 0x115   :  { %v130_v56 = vsub.f32 1.0, %v129_v54 }
 0x117   :  { %v131_v58 = vmul.f32 %v243_v52, %v130_v56 }
 0x119   :  { %v132_v62 = vadd.f32 %v243_v52, %v131_v58 }
 0x11b   :  { %v136_v5 = vsel %vm135_vm11, %v243_v52, %v132_v62 }
 0x11c   :  { %121 = vadd.xlane.f32.xlu2 %v120_v35  ;;  %v141_v7 = vsel %vm138_vm14, %v140_v2, %v136_v5 }
 0x13c   :  { %116 = vadd.xlane.f32.xlu1 %v115_v36 }
 0x17c   :  { %v167_v37 = vpop.permute.xlu1 %166 }
 0x17d   :  { %v168_v38 = vsel %vm165_vm8, %v167_v37, %v348_v28 }
 0x17e   :  { %172 = vrot.lane.b32.xlu0 %v168_v38, %s278_s0 }
 0x184   :  { %v170_v39 = vpop.permute.xlu1 %169 }
 0x185   :  { %v171_v40 = vsel %vm165_vm8, %v170_v39, %v351_v31 }
 0x186   :  { %174 = vrot.lane.b32.xlu1 %v171_v40, %s278_s0 }
 0x187   :  { %v89_v59 = vpop.xlane.xlu2 %88 }
 0x18f   :  { %v122_v8 = vpop.xlane.xlu2 %121 }
 0x190   :  { %v142_v12 = vmul.f32 %v141_v7, %v122_v8 }
 0x1a8   :  { %85 = vadd.xlane.f32.xlu0 %v84_v42 }
 0x1af   :  { %v117_v44 = vpop.xlane.xlu1 %116 }
 0x1b0   :  { %124 = vadd.xlane.f32.xlu1 %v123_v43  ;;  %v127_v51 = vmax.f32 %v117_v44, 1.0 }
 0x1b2   :  { %244 = vrcp.f32 %v127_v51  ;;  %vm148_vm12 = vweird.f32 %v127_v51  ;;  %v154_v1 = vand.u32 2147483648, %v127_v51  ;;  %v152_v4 = vand.u32 2147483647, %v127_v51 }
 0x1b3   :  { %246 = vlog2.f32 %v89_v59 }
 0x1b4   :  { %v155_v6 = vor.u32 1.1754944e-38, %v154_v1  ;;  %vm153_vm0 = vcmp.eq.f32.partialorder %v152_v4, 8.507059e+37 }
 0x1b8   :  { %v245_v53 = vpop.eup %244 }
 0x1b9   :  { %v144_v55 = vmul.f32 %v245_v53, %v127_v51  ;;  %vm149_vm13 = vweird.f32 %v245_v53  ;;  %v247_v10 = vpop.eup %246 }
 0x1ba   :  { %vm150_vm15 = vmor %vm148_vm12, %vm149_vm13  ;;  %v93_v19 = vmul.f32 0.6931472, %v247_v10 }
 0x1bb   :  { %v145_v57 = vsub.f32 1.0, %v144_v55 }
 0x1bd   :  { %v146_v61 = vmul.f32 %v245_v53, %v145_v57 }
 0x1bf   :  { %v147_v3 = vadd.f32 %v245_v53, %v146_v61 }
 0x1c1   :  { %v151_v9 = vsel %vm150_vm15, %v245_v53, %v147_v3 }
 0x1c2   :  { %v156_v14 = vsel %vm153_vm0, %v155_v6, %v151_v9 }
 0x1f0   :  { %v173_v45 = vpop.permute.xlu0 %172 }
 0x1f1   :  { %v176_v46 = vsel %vm165_vm8, %v173_v45, %v348_v28 }
 0x1f2   :  { %182 = vrot.lane.b32.xlu2 %v176_v46, %s279_s1 }
 0x1f8   :  { %v175_v47 = vpop.permute.xlu1 %174 }
 0x1f9   :  { %v177_v48 = vsel %vm165_vm8, %v175_v47, %v351_v31 }
 0x1fa   :  { %184 = vrot.lane.b32.xlu1 %v177_v48, %s279_s1 }
 0x21b   :  { %v86_v0 = vpop.xlane.xlu0 %85 }
 0x21c   :  { %248 = vlog2.f32 %v86_v0 }
 0x222   :  { %v249_v11 = vpop.eup %248 }
 0x223   :  { %v91_v13 = vmul.f32 0.6931472, %v249_v11  ;;  %v125_v17 = vpop.xlane.xlu1 %124 }
 0x224   :  { %v157_v20 = vmul.f32 %v156_v14, %v125_v17 }
 0x225   :  { %v158_v21 = vsub.f32 %v142_v12, %v91_v13 }
 0x226   :  { %v159_v22 = vsub.f32 %v157_v20, %v93_v19 }
 0x227   :  { %v160_v23 = vmul.f32 -7.142857, %v158_v21 }
 0x228   :  { %v161_v24 = vmul.f32 -7.142857, %v159_v22 }
 0x229   :  { %163 = vst.msk [vmem:[%s395_s5] sm:$0xff] %vm162_vm1, %v160_v23 }
 0x22a   :  { %164 = vst.msk [vmem:[%s395_s5 + $0x8] sm:$0xff] %vm162_vm1, %v161_v24  ;;  %s281_s5 = smov 128  }
 0x24c   :  { %v183_v25 = vpop.permute.xlu2 %182 }
 0x24d   :  { %v188_v26 = vsel %vm178_vm2, %v348_v28, %v183_v25 }
 0x24e   :  { %191 = vst.msk [vmem:[#allocation2] sm:$0xff] %vm190_vm3, %v188_v26 }
 0x26c   :  { %v185_v27 = vpop.permute.xlu1 %184 }
 0x26d   :  { %v189_v29 = vsel %vm179_vm4, %v351_v31, %v185_v27 }
 0x26e   :  { %192 = vst.msk [vmem:[#allocation2 + $0x8] sm:$0xff] %vm190_vm3, %v189_v29 }
 0x26f   :  { %205 = dma.vmem_to_hbm [thread:$0]  %s198_s6, 256, %s200_s9, [#allocation3], %s281_s5, %s281_s5, %s282_s10  }
 0x270   :  { %274 = dma.done.wait [#allocation3], 256  }
 0x271   :  { %275 = vsyncadd [#allocation3], 4294967040 }
 0x272   :  { %214 = vsyncpa [#allocation3], 1 }

</bundles_post_ra>
